<compile_context>
chip_gen: v7x
topology: tpu7x:2x2x1
jax: 0.10.0
libtpu: 0.0.40
codegen_flags: <defaults>
</compile_context>

<pallas_src>
import functools

import jax
import jax.numpy as jnp
from jax.experimental import pallas as pl
from jax.experimental.pallas import tpu as pltpu

batch_size = 1
input_size = 4
hidden_size = 4


def rnncell_kernel(x_ref, h_ref, w_ref, out_ref, *, isize, hsize):
    # x_ref: (B, I)   input
    # h_ref: (B, H)   previous hidden state
    # w_ref: (I+H+1, H)  rows [0:I] = W_ih^T, rows [I:I+H] = W_hh^T,
    #                    row  [I+H] = b_ih + b_hh
    # out_ref: (B, H) new hidden state
    w_ih_t = w_ref[:isize, :]                       # (I, H) static slice
    w_hh_t = w_ref[isize:isize + hsize, :]          # (H, H) static slice
    bias = w_ref[isize + hsize:isize + hsize + 1, :]  # (1, H) static slice

    pre = (
        jnp.dot(x_ref[...], w_ih_t, preferred_element_type=jnp.float32)
        + jnp.dot(h_ref[...], w_hh_t, preferred_element_type=jnp.float32)
        + bias
    )
    out_ref[...] = jnp.tanh(pre).astype(out_ref.dtype)


def prepare_rnncell_params(w_ih, w_hh, b_ih, b_hh):
    """One-time param prep (hoisted out of the per-step path).

    w_ih: (H, I), w_hh: (H, H), b_ih/b_hh: (H,)
    Returns w_aug: (I+H+1, H) = [W_ih^T ; W_hh^T ; b_ih+b_hh].
    """
    w_aug = jnp.concatenate(
        [
            jnp.transpose(w_ih),                 # (I, H)
            jnp.transpose(w_hh),                 # (H, H)
            (b_ih + b_hh).reshape(1, -1),        # (1, H)
        ],
        axis=0,
    )
    return w_aug


def rnncell_forward(x, h, w_aug):
    """x: (B, I), h: (B, H), w_aug: (I+H+1, H) -> new hidden (B, H)."""
    B, I = x.shape
    H = h.shape[1]

    kernel = functools.partial(rnncell_kernel, isize=I, hsize=H)

    itemsize = jnp.dtype(x.dtype).itemsize
    cost = pl.CostEstimate(
        flops=2 * B * (I + H) * H + B * H,
        transcendentals=B * H,
        bytes_accessed=(x.size + h.size + w_aug.size + B * H) * itemsize,
    )

    # Whole problem is a handful of (8,128) tiles: single un-gridded VMEM
    # block, no pipelining, no megacore splitting.
    return pl.pallas_call(
        kernel,
        out_shape=jax.ShapeDtypeStruct((B, H), x.dtype),
        in_specs=[
            pl.BlockSpec(memory_space=pltpu.MemorySpace.VMEM),  # x
            pl.BlockSpec(memory_space=pltpu.MemorySpace.VMEM),  # h
            pl.BlockSpec(memory_space=pltpu.MemorySpace.VMEM),  # w_aug
        ],
        out_specs=pl.BlockSpec(memory_space=pltpu.MemorySpace.VMEM),
        cost_estimate=cost,
    )(x, h, w_aug)


if __name__ == "__main__":
    key = jax.random.PRNGKey(0)
    kx, k1, k2, k3, k4 = jax.random.split(key, 5)

    # PyTorch RNNCell init: uniform(-1/sqrt(hidden), 1/sqrt(hidden))
    stdv = 1.0 / (hidden_size ** 0.5)
    w_ih = jax.random.uniform(k1, (hidden_size, input_size), jnp.float32, -stdv, stdv)
    w_hh = jax.random.uniform(k2, (hidden_size, hidden_size), jnp.float32, -stdv, stdv)
    b_ih = jax.random.uniform(k3, (hidden_size,), jnp.float32, -stdv, stdv)
    b_hh = jax.random.uniform(k4, (hidden_size,), jnp.float32, -stdv, stdv)

    x = jax.random.normal(kx, (batch_size, input_size), jnp.float32)
    h0 = jnp.zeros((batch_size, hidden_size), jnp.float32)  # Model.init_hidden()

    # One-time param prep (lives at model-init time, not per step).
    w_aug = prepare_rnncell_params(w_ih, w_hh, b_ih, b_hh)

    h1 = rnncell_forward(x, h0, w_aug)
    h1 = jax.block_until_ready(h1)

    # Pure-JAX reference check of the forward semantics.
    ref = jnp.tanh(x @ w_ih.T + b_ih + h0 @ w_hh.T + b_hh)
    assert h1.shape == (batch_size, hidden_size)
    assert jnp.allclose(h1, ref, atol=1e-5), (h1, ref)

    print("KERNEL_OK")
</pallas_src>

<mosaic_0001>
module attributes {stable_mosaic.version = 11 : i64} {
  func.func @rnncell_kernel(%arg0: memref<1x4xf32, #tpu.memory_space<vmem>>, %arg1: memref<1x4xf32, #tpu.memory_space<vmem>>, %arg2: memref<9x4xf32, #tpu.memory_space<vmem>>, %arg3: memref<1x4xf32, #tpu.memory_space<vmem>>) attributes {dimension_semantics = [], scalar_prefetch = 0 : i64, scratch_operands = 0 : i64, tpu.core_type = #tpu.core_type<tc>} {
    %c0 = arith.constant 0 : index
    %c0_0 = arith.constant 0 : index
    %0 = vector.load %arg2[%c0, %c0_0] : memref<9x4xf32, #tpu.memory_space<vmem>>, vector<4x4xf32>
    %c4 = arith.constant 4 : index
    %c0_1 = arith.constant 0 : index
    %1 = vector.load %arg2[%c4, %c0_1] : memref<9x4xf32, #tpu.memory_space<vmem>>, vector<4x4xf32>
    %c8 = arith.constant 8 : index
    %c0_2 = arith.constant 0 : index
    %2 = vector.load %arg2[%c8, %c0_2] : memref<9x4xf32, #tpu.memory_space<vmem>>, vector<1x4xf32>
    %c0_3 = arith.constant 0 : index
    %c0_4 = arith.constant 0 : index
    %3 = vector.load %arg0[%c0_3, %c0_4] : memref<1x4xf32, #tpu.memory_space<vmem>>, vector<1x4xf32>
    %cst = arith.constant dense<0.000000e+00> : vector<1x4xf32>
    %4 = tpu.matmul %3, %0, %cst {dimension_numbers = #tpu.dot_dimension_numbers<[1], [0], [0], [1], [0, 0, 1, 1], [], []>} : vector<1x4xf32>, vector<4x4xf32>, vector<1x4xf32> -> vector<1x4xf32>
    %c0_5 = arith.constant 0 : index
    %c0_6 = arith.constant 0 : index
    %5 = vector.load %arg1[%c0_5, %c0_6] : memref<1x4xf32, #tpu.memory_space<vmem>>, vector<1x4xf32>
    %cst_7 = arith.constant dense<0.000000e+00> : vector<1x4xf32>
    %6 = tpu.matmul %5, %1, %cst_7 {dimension_numbers = #tpu.dot_dimension_numbers<[1], [0], [0], [1], [0, 0, 1, 1], [], []>} : vector<1x4xf32>, vector<4x4xf32>, vector<1x4xf32> -> vector<1x4xf32>
    %7 = arith.addf %4, %6 : vector<1x4xf32>
    %8 = arith.addf %7, %2 : vector<1x4xf32>
    %9 = math.tanh %8 : vector<1x4xf32>
    %c0_8 = arith.constant 0 : index
    %c0_9 = arith.constant 0 : index
    %10 = vector.load %arg3[%c0_8, %c0_9] : memref<1x4xf32, #tpu.memory_space<vmem>>, vector<1x4xf32>
    tpu.vector_store %arg3[%c0_8, %c0_9], %9 {strides = array<i32>} : memref<1x4xf32, #tpu.memory_space<vmem>>, vector<1x4xf32>,
    return
  }
}

</mosaic_0001>

<bundles_post_ra>
// kernel: tpu_custom_call.1
= control target key start
LH: loop header
LB: loop body
LE: loop exit
PB: predicated region body
PF: predicated region fallthrough
CT: control target
= control target key end

     0   :  { %vm24_vm0 = vcmask 1043456   ;;  %vm20_vm1 = vcmask 31744   ;;  %v239_v1 = vmov 0.0   ;;  %vm240_vm2 = vmmov 0   ;;  %s289_s0 = inlined_call_operand.vmem [shape: f32[1,4], index: 0, kind: input, shape index: {}]   ;;  %s290_s1 = inlined_call_operand.vmem [shape: f32[1,4], index: 1, kind: input, shape index: {}]   ;;  %s291_s2 = inlined_call_operand.vmem [shape: f32[9,4], index: 2, kind: input, shape index: {}]   ;;  %s292_s3 = inlined_call_operand.hbm [shape: f32[1,4], index: 3, kind: output, shape index: {}]  }
   0x1   :  { %v16_v0 = vld [vmem:[%s291_s2 + $0x4] sm:$0xf]  ;;  %200 = vmatprep.subr.mxu0 %v239_v1  ;;  %205 = vmatprep.subr.mxu1 %v239_v1  ;;  %v15_v2 = vld [vmem:[%s291_s2] sm:$0xf] }
   0x2   :  { %v19_v3 = vld [vmem:[%s290_s1] sm:$0x1]  ;;  %201 = vmatpush3.msk.msra.mxu0 %vm24_vm0, %v16_v0  ;;  %202 = vmatprep.mubr.msk.f32.mxu0 %vm240_vm2, %v239_v1 }
   0x3   :  { %v18_v4 = vld [vmem:[%s289_s0] sm:$0x1] }
   0x4   :  { %8 = vsyncpa [#allocation3], 0  ;;  %206 = vmatpush3.msk.msra.mxu1 %vm24_vm0, %v15_v2  ;;  %207 = vmatprep.mubr.msk.f32.mxu1 %vm240_vm2, %v239_v1  ;;  %v17_v6 = vld [vmem:[%s291_s2 + $0x8] sm:$0x1]  ;;  %s241_s0 = smov [#allocation2]   ;;  %vm176_vm3 = vcmask 24576  }
   0x5   :  { %203 = vmatmul.mubr.msk.f32.vlgmr.msra.gmra.mrb[0].mxu0 %vm20_vm1, %v19_v3  ;;  %208 = vmatmul.mubr.msk.f32.vlgmr.msra.gmra.mrb[0].mxu1 %vm20_vm1, %v18_v4  ;;  %s184_s1 = sshll.u32 %s241_s0, 4  ;;  %s185_s1 = int_to_ptr.vmem [resolvable:$true] %s184_s1 }
   0x6   :  { %s215_s22 = scalar_lea.vmem %s185_s1, 16  ;;  %s219_s23 = scalar_lea.vmem %s185_s1, 32 }
   0x7   :  { %p216_p0 = scmp.ne.s32.totalorder %s185_s1, %s215_s22  ;;  %p220_p1 = scmp.lt.s32.totalorder %s185_s1, %s185_s1 }
   0x8   :  { %p221_p2 = scmp.lt.s32.totalorder %s219_s23, %s215_s22 }
   0xa   :  { %p222_p3 = por %p221_p2, %p220_p1 }
   0xc   :  { %p223_p4 = pnand %p222_p3, %p216_p0 }
  0xd8   :  { %v94_v5 = vpop.f32.mrb[0].mxu0  ;;  %v170_v7 = vpop.f32.mrb[0].mxu1 }
  0xd9   :  { %v171_v8 = vadd.f32 %v170_v7, %v94_v5  ;;  %v204_v9 = vpop.f32.mrb[1].mxu0  ;;  %v209_v10 = vpop.f32.mrb[1].mxu1 }
  0xdb   :  { %v174_v11 = vadd.f32 %v171_v8, %v17_v6 }
  0xdd   :  { %213 = vtanh.f32 %v174_v11 }
  0xe7   :  { %v214_v12 = vpop.eup %213 }
  0xe8   :  { %177 = vst.msk [vmem:[#allocation2] sm:$0x1] %vm176_vm3, %v214_v12 }
  0xe9   :  { %226 = shalt.err (!%p223_p4)
}
  0xea   :  { %s227_s25 = scalar_lea.hbm %s292_s3, 16 }
  0xeb   :  { %p228_p5 = scmp.ne.s32.totalorder %s292_s3, %s227_s25  ;;  %p231_p6 = scmp.lt.u32.totalorder %s227_s25, %s292_s3 }
  0xed   :  { %p233_p7 = pnand %p231_p6, %p228_p5 }
  0xef   :  { %236 = shalt.err (!%p233_p7)
}
  0xf0   :  { %187 = dma.vmem_to_hbm [thread:$0]  %s185_s1, 16, %s292_s3, [#allocation3]  }
  0xf1   :  { %237 = dma.done.wait [#allocation3], 16  }
  0xf2   :  { %238 = vsyncadd [#allocation3], 4294967280 }
  0xf3   :  { %191 = vsyncpa [#allocation3], 1 }

</bundles_post_ra>
